<compile_context>
chip_gen: v7x
topology: tpu7x:2x2x1
jax: 0.10.0
libtpu: 0.0.40
codegen_flags: <defaults>
</compile_context>

<pallas_src>
import jax
import jax.numpy as jnp
from jax import lax
from jax.experimental import pallas as pl
from jax.experimental.pallas import tpu as pltpu


def _gpe_kernel(last_t_ref, glob_ref, block_ref, out_ref):
    # last_t_ref: (B,) int32 in SMEM         -- per-batch gather index
    # glob_ref:   (max_timestep, E) in VMEM  -- whole global-position table
    # block_ref:  (T, E) in VMEM             -- block position embedding[:T]
    # out_ref:    (B, T, E) in VMEM
    max_timestep = glob_ref.shape[0]
    batch = out_ref.shape[0]

    # Load block embedding once (hoisted out of the per-batch loop); f32 math.
    block = block_ref[...].astype(jnp.float32)  # (T, E)

    def body(b, carry):
        # Clamp guards against out-of-range timesteps (no VMEM bounds check).
        idx = jnp.clip(last_t_ref[b], 0, max_timestep - 1)
        row = glob_ref[pl.ds(idx, 1), :].astype(jnp.float32)  # (1, E) gathered row
        out_ref[b] = (block + row).astype(out_ref.dtype)       # (T, E) broadcast add
        return carry

    # Short fixed trip count -> unroll for full LLO scheduler visibility.
    lax.fori_loop(0, batch, body, 0, unroll=True)


def global_position_encoding(t, global_pos_emb, block_pos_emb):
    """t: (B, T) int.  global_pos_emb: (1, max_timestep, E).  block_pos_emb: (1, 3*ctx, E)."""
    B, T = t.shape
    _, max_timestep, E = global_pos_emb.shape
    assert block_pos_emb.shape[2] == E
    assert block_pos_emb.shape[1] >= T, "sequence length exceeds block position embedding"

    out_dtype = jnp.result_type(global_pos_emb.dtype, block_pos_emb.dtype)

    last_t = t[:, -1].astype(jnp.int32)   # (B,) gather indices -> SMEM
    glob = global_pos_emb[0]              # (max_timestep, E)   -> VMEM (resident)
    block = block_pos_emb[0, :T, :]       # (T, E)              -> VMEM (only needed rows)

    return pl.pallas_call(
        _gpe_kernel,
        out_shape=jax.ShapeDtypeStruct((B, T, E), out_dtype),
        in_specs=[
            pl.BlockSpec(memory_space=pltpu.MemorySpace.SMEM),  # last_t scalars
            pl.BlockSpec(memory_space=pltpu.MemorySpace.VMEM),  # global table (whole)
            pl.BlockSpec(memory_space=pltpu.MemorySpace.VMEM),  # block rows [:T]
        ],
        out_specs=pl.BlockSpec(memory_space=pltpu.MemorySpace.VMEM),
    )(last_t, glob, block)


if __name__ == "__main__":
    # Small shapes consistent with the module's forward.  embed_dim=128 keeps
    # the output lane-dense; the kernel handles any E.
    embed_dim = 128
    max_timestep = 64
    context_size = 8
    batch_size = 2

    key = jax.random.PRNGKey(0)
    k1, k2, k3 = jax.random.split(key, 3)
    # Module init is zeros; use random values so the gather/add is exercised.
    global_pos_emb = jax.random.normal(k1, (1, max_timestep, embed_dim), jnp.float32)
    block_pos_emb = jax.random.normal(k2, (1, 3 * context_size, embed_dim), jnp.float32)
    t = jax.random.randint(k3, (batch_size, context_size), 0, max_timestep, dtype=jnp.int32)

    out = jax.jit(global_position_encoding)(t, global_pos_emb, block_pos_emb)
    out = jax.block_until_ready(out)

    # Pure-JAX reference for correctness.
    last = t[:, -1]
    ref = global_pos_emb[0][last][:, None, :] + block_pos_emb[:, :context_size, :]
    assert out.shape == (batch_size, context_size, embed_dim), out.shape
    assert out.dtype == ref.dtype, (out.dtype, ref.dtype)
    assert jnp.allclose(out, ref, atol=1e-6), "mismatch vs reference"

    print("KERNEL_OK")
</pallas_src>

<mosaic_0001>
module attributes {stable_mosaic.version = 11 : i64} {
  func.func @_gpe_kernel(%arg0: memref<2xi32, #tpu.memory_space<smem>>, %arg1: memref<64x128xf32, #tpu.memory_space<vmem>>, %arg2: memref<8x128xf32, #tpu.memory_space<vmem>>, %arg3: memref<2x8x128xf32, #tpu.memory_space<vmem>>) attributes {dimension_semantics = [], scalar_prefetch = 0 : i64, scratch_operands = 0 : i64, tpu.core_type = #tpu.core_type<tc>} {
    %c0 = arith.constant 0 : index
    %c0_0 = arith.constant 0 : index
    %0 = vector.load %arg2[%c0, %c0_0] : memref<8x128xf32, #tpu.memory_space<vmem>>, vector<8x128xf32>
    %c0_i32 = arith.constant 0 : i32
    %1 = arith.index_cast %c0_i32 : i32 to index
    %2 = memref.load %arg0[%1] : memref<2xi32, #tpu.memory_space<smem>>
    %c0_i32_1 = arith.constant 0 : i32
    %c63_i32 = arith.constant 63 : i32
    %3 = arith.maxsi %c0_i32_1, %2 : i32
    %4 = arith.minsi %c63_i32, %3 : i32
    %5 = arith.index_cast %4 : i32 to index
    %c0_2 = arith.constant 0 : index
    %6 = vector.load %arg1[%5, %c0_2] : memref<64x128xf32, #tpu.memory_space<vmem>>, vector<1x128xf32>
    %7 = vector.broadcast %6 : vector<1x128xf32> to vector<8x128xf32>
    %8 = arith.addf %0, %7 : vector<8x128xf32>
    %9 = arith.index_cast %c0_i32 : i32 to index
    %c0_3 = arith.constant 0 : index
    %c0_4 = arith.constant 0 : index
    %10 = vector.load %arg3[%9, %c0_3, %c0_4] : memref<2x8x128xf32, #tpu.memory_space<vmem>>, vector<1x8x128xf32>
    %11 = vector.shape_cast %10 : vector<1x8x128xf32> to vector<8x128xf32>
    %12 = vector.shape_cast %8 : vector<8x128xf32> to vector<1x8x128xf32>
    tpu.vector_store %arg3[%9, %c0_3, %c0_4], %12 {strides = array<i32>} : memref<2x8x128xf32, #tpu.memory_space<vmem>>, vector<1x8x128xf32>,
    %c1_i32 = arith.constant 1 : i32
    %13 = arith.index_cast %c1_i32 : i32 to index
    %14 = memref.load %arg0[%13] : memref<2xi32, #tpu.memory_space<smem>>
    %c0_i32_5 = arith.constant 0 : i32
    %c63_i32_6 = arith.constant 63 : i32
    %15 = arith.maxsi %c0_i32_5, %14 : i32
    %16 = arith.minsi %c63_i32_6, %15 : i32
    %17 = arith.index_cast %16 : i32 to index
    %c0_7 = arith.constant 0 : index
    %18 = vector.load %arg1[%17, %c0_7] : memref<64x128xf32, #tpu.memory_space<vmem>>, vector<1x128xf32>
    %19 = vector.broadcast %18 : vector<1x128xf32> to vector<8x128xf32>
    %20 = arith.addf %0, %19 : vector<8x128xf32>
    %21 = arith.index_cast %c1_i32 : i32 to index
    %c0_8 = arith.constant 0 : index
    %c0_9 = arith.constant 0 : index
    %22 = vector.load %arg3[%21, %c0_8, %c0_9] : memref<2x8x128xf32, #tpu.memory_space<vmem>>, vector<1x8x128xf32>
    %23 = vector.shape_cast %22 : vector<1x8x128xf32> to vector<8x128xf32>
    %24 = vector.shape_cast %20 : vector<8x128xf32> to vector<1x8x128xf32>
    tpu.vector_store %arg3[%21, %c0_8, %c0_9], %24 {strides = array<i32>} : memref<2x8x128xf32, #tpu.memory_space<vmem>>, vector<1x8x128xf32>,
    %c2_i32 = arith.constant 2 : i32
    return
  }
}

</mosaic_0001>

<bundles_post_ra>
// kernel: global_position_encoding.1
= control target key start
LH: loop header
LB: loop body
LE: loop exit
PB: predicated region body
PF: predicated region fallthrough
CT: control target
= control target key end

     0   :  { %8 = vsyncpa [#allocation5], 0  ;;  %s235_s0 = inlined_call_operand.vmem [shape: s32[2], index: 0, kind: input, shape index: {}]   ;;  %s236_s1 = inlined_call_operand.hbm [shape: f32[64,128], index: 1, kind: input, shape index: {}]   ;;  %s237_s2 = inlined_call_operand.vmem [shape: f32[8,128], index: 2, kind: input, shape index: {}]   ;;  %s238_s3 = inlined_call_operand.hbm [shape: f32[2,8,128], index: 3, kind: output, shape index: {}]  }
   0x1   :  { %9 = vsyncpa [#allocation3], 0 }
   0x2   :  { %10 = vsyncpa [#allocation4], 0  ;;  %s17_s14 = sshll.u32 %s235_s0, 4  ;;  %s18_s14 = int_to_ptr.vmem [resolvable:$true] %s17_s14 }
   0x3   :  { %s112_s15 = scalar_lea.vmem %s18_s14, 16  ;;  %p117_p1 = scmp.lt.s32.totalorder %s18_s14, %s18_s14 }
   0x4   :  { %p113_p0 = scmp.ne.s32.totalorder %s18_s14, %s112_s15  ;;  %p118_p2 = scmp.lt.s32.totalorder %s112_s15, %s112_s15 }
   0x6   :  { %p119_p3 = por %p118_p2, %p117_p1 }
   0x8   :  { %p120_p4 = pnand %p119_p3, %p113_p0 }
   0xa   :  { %123 = shalt.err (!%p120_p4)
}
   0xb   :  { %s174_s16 = smov [#allocation2]   ;;  %s175_s17 = smov [#allocation6]  }
   0xc   :  { %20 = dma.vmem_to_smem %s18_s14, 16, %s174_s16, [#allocation5]  }
   0xd   :  { %s26_s18 = sshll.u32 %s175_s17, 4  ;;  %s124_s21 = scalar_lea.hbm %s236_s1, 1024  ;;  %s27_s18 = int_to_ptr.vmem [resolvable:$true] %s26_s18 }
   0xe   :  { %p125_p5 = scmp.ne.s32.totalorder %s236_s1, %s124_s21  ;;  %p128_p6 = scmp.lt.u32.totalorder %s124_s21, %s236_s1 }
  0x10   :  { %p130_p7 = pnand %p128_p6, %p125_p5 }
  0x12   :  { %133 = shalt.err (!%p130_p7)
}
  0x13   :  { %s134_s25 = scalar_lea.vmem %s27_s18, 1024  ;;  %p139_p9 = scmp.lt.s32.totalorder %s27_s18, %s27_s18 }
  0x14   :  { %p135_p8 = scmp.ne.s32.totalorder %s27_s18, %s134_s25  ;;  %p140_p10 = scmp.lt.s32.totalorder %s134_s25, %s134_s25 }
  0x16   :  { %p141_p11 = por %p140_p10, %p139_p9 }
  0x18   :  { %p142_p12 = pnand %p141_p11, %p135_p8 }
  0x1a   :  { %145 = shalt.err (!%p142_p12)
}
  0x1b   :  { %s176_s26 = smov 128   ;;  %s177_s27 = smov 8  }
  0x1c   :  { %32 = dma.hbm_to_vmem [thread:$0]  %s236_s1, 1024, %s27_s18, [#allocation3], %s176_s26, %s176_s26, %s177_s27  }
  0x1d   :  { %168 = dma.done.wait [#allocation5], 16  }
  0x1e   :  { %169 = vsyncadd [#allocation5], 4294967280 }
  0x1f   :  { %170 = dma.done.wait [#allocation3], 1024  }
  0x20   :  { %171 = vsyncadd [#allocation3], 4294966272 }
  0x21   :  { %41 = sfence }
  0x22   :  { %s43_s30 = sld [smem:[#allocation2]]  ;;  %s96_s4 = sld [smem:[#allocation2 + $0x1]]  ;;  %v42_v0 = vld [vmem:[%s237_s2] sm:$0xff] }
  0x23   :  { %s178_s1 = smov [#allocation7]  }
  0x24   :  { %s75_s7 = sshll.u32 %s178_s1, 4  ;;  %s76_s7 = int_to_ptr.vmem [resolvable:$true] %s75_s7 }
  0x25   :  { %s146_s10 = scalar_lea.vmem %s76_s7, 256  ;;  %p151_p4 = scmp.lt.s32.totalorder %s76_s7, %s76_s7 }
  0x26   :  { %p147_p3 = scmp.ne.s32.totalorder %s76_s7, %s146_s10  ;;  %p152_p5 = scmp.lt.s32.totalorder %s146_s10, %s146_s10 }
  0x28   :  { %p44_p13 = scmp.gt.s32.totalorder %s43_s30, 0  ;;  %p90_p0 = scmp.lt.s32.totalorder %s43_s30, 63 }
  0x29   :  { %p57_p1 = scmp.gt.s32.totalorder %s96_s4, 0  ;;  %p97_p2 = scmp.lt.s32.totalorder %s96_s4, 63 }
  0x2a   :  { %s240_s30 = smov (!%p44_p13, %s43_s30), 0  ;;  %p153_p6 = por %p152_p5, %p151_p4 }
  0x2b   :  { %s242_s4 = smov (!%p57_p1, %s96_s4), 0  ;;  %s244_s30 = smov (!%p90_p0, %s240_s30), 63 }
  0x2c   :  { %s246_s4 = smov (!%p97_p2, %s242_s4), 63  ;;  %s48_s8 = scalar_lea.vmem [#allocation6], %s244_s30 }
  0x2d   :  { %v95_v1 = vld [vmem:[%s48_s8] ss:$0 sm:$0xff]  ;;  %s61_s9 = scalar_lea.vmem [#allocation6], %s246_s4  ;;  %p154_p7 = pnand %p153_p6, %p147_p3 }
  0x2e   :  { %v54_v2 = vadd.f32 %v95_v1, %v42_v0  ;;  %v102_v3 = vld [vmem:[%s61_s9] ss:$0 sm:$0xff] }
  0x2f   :  { %v67_v4 = vadd.f32 %v102_v3, %v42_v0 }
  0x30   :  { %55 = vst [vmem:[#allocation7] sm:$0xff] %v54_v2 }
  0x31   :  { %69 = vst [vmem:[#allocation7 + $0x8] sm:$0xff] %v67_v4 }
  0x32   :  { %157 = shalt.err (!%p154_p7)
}
  0x33   :  { %s158_s12 = scalar_lea.hbm %s238_s3, 256 }
  0x34   :  { %p159_p8 = scmp.ne.s32.totalorder %s238_s3, %s158_s12  ;;  %p162_p9 = scmp.lt.u32.totalorder %s158_s12, %s238_s3 }
  0x36   :  { %p164_p10 = pnand %p162_p9, %p159_p8 }
  0x38   :  { %167 = shalt.err (!%p164_p10)
}
  0x39   :  { %81 = dma.vmem_to_hbm [thread:$0]  %s76_s7, 256, %s238_s3, [#allocation4], %s176_s26, %s176_s26, %s177_s27  }
  0x3a   :  { %172 = dma.done.wait [#allocation4], 256  }
  0x3b   :  { %173 = vsyncadd [#allocation4], 4294967040 }
  0x3c   :  { %85 = vsyncpa [#allocation3], 1 }
  0x3d   :  { %86 = vsyncpa [#allocation4], 1 }
  0x3e   :  { %87 = vsyncpa [#allocation5], 1 }

</bundles_post_ra>
